<compile_context>
chip_gen: v7x
topology: tpu7x:2x2x1
jax: 0.10.0
libtpu: 0.0.40
codegen_flags: <defaults>
</compile_context>

<pallas_src>
import functools

import jax
import jax.numpy as jnp
from jax.experimental import pallas as pl
from jax.experimental.pallas import tpu as pltpu

LANE = 128  # TPU lane width; hidden dims (64, 64, 32) and action_size<=128 fit one lane tile.


def actor_kernel(x_ref, w1_ref, w2_ref, w3_ref, w4_ref, bias_ref, out_ref,
                 *, epilogue_dtype):
    ep = epilogue_dtype
    zero = jnp.zeros((), ep)

    bias_f32 = bias_ref[...]            # (4, 128) f32, row i = bias of layer i+1
    bias_ep = bias_f32.astype(ep)       # no-op when ep == f32

    # fc1 + relu  (bf16 MXU operands, f32 accumulation; epilogue in `ep`)
    x = x_ref[...].astype(jnp.bfloat16)
    h = jnp.dot(x, w1_ref[...], preferred_element_type=jnp.float32)
    h = jnp.maximum(h.astype(ep) + bias_ep[0, :h.shape[1]], zero).astype(jnp.bfloat16)

    # fc2 + relu
    h = jnp.dot(h, w2_ref[...], preferred_element_type=jnp.float32)
    h = jnp.maximum(h.astype(ep) + bias_ep[1, :h.shape[1]], zero).astype(jnp.bfloat16)

    # fc3 + relu
    h = jnp.dot(h, w3_ref[...], preferred_element_type=jnp.float32)
    h = jnp.maximum(h.astype(ep) + bias_ep[2, :h.shape[1]], zero).astype(jnp.bfloat16)

    # fc4 (logits, no activation).  w4 is lane-padded to 128 for the MXU; the
    # padded columns are zero, so slicing to the true action dim before the
    # store is exact and the output written to HBM is only (tb, action_size).
    logits = jnp.dot(h, w4_ref[...], preferred_element_type=jnp.float32)
    a = out_ref.shape[1]
    out_ref[...] = (logits[:, :a] + bias_f32[3, :a]).astype(out_ref.dtype)


def _round_up(x, m):
    return ((x + m - 1) // m) * m


def _choose_batch_tile(batch):
    """Pick a batch tile (multiple of 8).  Ragged last blocks are handled by
    Pallas (OOB reads padded, OOB writes dropped) so no divisibility needed.
    Large tiles amortize the ~0.35us/step overhead; when the batch is big
    enough we prefer an even number of >=2 grid steps (balanced across v7x's
    two TensorCores)."""
    if batch <= 16:
        return _round_up(max(batch, 1), 8)          # single tiny step
    if batch <= 1024:
        return _round_up(pl.cdiv(batch, 2), 8)      # exactly two ~equal steps
    for tb in (1024, 512):
        if pl.cdiv(batch, tb) % 2 == 0:
            return tb
    return 512


def _epilogue_dtype():
    """bf16 bias/ReLU epilogue only where the VPU supports bf16 (v6e / v7x)."""
    try:
        kind = jax.devices()[0].device_kind.lower()
    except Exception:
        return jnp.float32
    if "v6" in kind or "v7" in kind:
        return jnp.bfloat16
    return jnp.float32


def pack_actor_params(params):
    """Cast weights to bf16, lane-pad fc4's output dim to 128 (zeros), and pack
    the four biases into one lane-aligned (4, 128) f32 buffer (one DMA)."""
    w1 = params["w1"].astype(jnp.bfloat16)
    w2 = params["w2"].astype(jnp.bfloat16)
    w3 = params["w3"].astype(jnp.bfloat16)

    w4_f32 = params["w4"]
    fan_in4, action_size = w4_f32.shape
    assert action_size <= LANE, "action_size > 128 needs multi-tile padding"
    w4 = jnp.zeros((fan_in4, LANE), jnp.float32).at[:, :action_size].set(w4_f32)
    w4 = w4.astype(jnp.bfloat16)

    bias = jnp.zeros((4, LANE), jnp.float32)
    for i, name in enumerate(("b1", "b2", "b3", "b4")):
        b = params[name].reshape(-1)
        assert b.shape[0] <= LANE
        bias = bias.at[i, : b.shape[0]].set(b)

    return {"w1": w1, "w2": w2, "w3": w3, "w4": w4, "bias": bias,
            "action_size": action_size}


def actor_forward(state, packed, *, batch_tile=None, epilogue_dtype=None):
    """Run the Actor MLP forward pass via pallas_call.

    state:  (B, state_size) float32
    packed: output of pack_actor_params (bf16 weights, packed f32 biases)
    returns (B, action_size) float32 logits
    """
    B, S = state.shape
    w1, w2, w3, w4 = packed["w1"], packed["w2"], packed["w3"], packed["w4"]
    bias = packed["bias"]
    A = packed["action_size"]

    tb = batch_tile if batch_tile is not None else _choose_batch_tile(B)
    assert tb % 8 == 0, "batch_tile must be a multiple of 8"
    grid = (pl.cdiv(B, tb),)

    ep = epilogue_dtype if epilogue_dtype is not None else _epilogue_dtype()

    def tile_map(i):
        return (i, 0)

    def full_map(i):
        return (0, 0)

    H1, H2, H3 = w1.shape[1], w2.shape[1], w3.shape[1]
    flops = 2 * B * (S * H1 + H1 * H2 + H2 * H3 + H3 * A)
    bytes_accessed = (B * S * 4 + B * A * 4
                      + 2 * (w1.size + w2.size + w3.size + w4.size)
                      + bias.size * 4)

    out = pl.pallas_call(
        functools.partial(actor_kernel, epilogue_dtype=ep),
        out_shape=jax.ShapeDtypeStruct((B, A), jnp.float32),
        grid=grid,
        in_specs=[
            pl.BlockSpec((tb, S), tile_map),       # state tile
            pl.BlockSpec(w1.shape, full_map),      # fc1 weight (bf16, resident)
            pl.BlockSpec(w2.shape, full_map),      # fc2 weight (bf16, resident)
            pl.BlockSpec(w3.shape, full_map),      # fc3 weight (bf16, resident)
            pl.BlockSpec(w4.shape, full_map),      # fc4 weight (bf16, lane-padded)
            pl.BlockSpec(bias.shape, full_map),    # packed biases (f32)
        ],
        out_specs=pl.BlockSpec((tb, A), tile_map), # un-padded logits
        compiler_params=pltpu.CompilerParams(
            dimension_semantics=("parallel",),
        ),
        cost_estimate=pl.CostEstimate(
            flops=int(flops), transcendentals=0,
            bytes_accessed=int(bytes_accessed)),
    )(state, w1, w2, w3, w4, bias)

    return out


def init_actor_params(key, state_size, action_size,
                      fc1_units=64, fc2_units=64, fc3_units=32):
    """Init mimicking PyTorch nn.Linear default (U[-1/sqrt(fan_in), 1/sqrt(fan_in)]).

    Weights stored as (in_features, out_features); biases as (1, out_features).
    """
    dims = [(state_size, fc1_units),
            (fc1_units, fc2_units),
            (fc2_units, fc3_units),
            (fc3_units, action_size)]
    params = {}
    keys = jax.random.split(key, 2 * len(dims))
    for idx, (fan_in, fan_out) in enumerate(dims):
        bound = 1.0 / jnp.sqrt(jnp.float32(fan_in))
        wk, bk = keys[2 * idx], keys[2 * idx + 1]
        params[f"w{idx + 1}"] = jax.random.uniform(
            wk, (fan_in, fan_out), jnp.float32, minval=-bound, maxval=bound)
        params[f"b{idx + 1}"] = jax.random.uniform(
            bk, (1, fan_out), jnp.float32, minval=-bound, maxval=bound)
    return params


def actor_forward_ref(state, params, epilogue_dtype=jnp.float32):
    """Pure-JAX reference using the same bf16-operand / f32-accumulate math and
    the same epilogue dtype as the kernel."""
    ep = epilogue_dtype
    zero = jnp.zeros((), ep)

    def hidden(x, w, b):
        h = jnp.dot(x.astype(jnp.bfloat16), w.astype(jnp.bfloat16),
                    preferred_element_type=jnp.float32)
        return jnp.maximum(h.astype(ep) + b.astype(ep), zero).astype(jnp.bfloat16)

    x = hidden(state, params["w1"], params["b1"])
    x = hidden(x, params["w2"], params["b2"])
    x = hidden(x, params["w3"], params["b3"])
    return jnp.dot(x, params["w4"].astype(jnp.bfloat16),
                   preferred_element_type=jnp.float32) + params["b4"]


def actor_forward_ref_f32(state, params):
    """Full-precision f32 reference (sanity bound only)."""
    x = jnp.maximum(state @ params["w1"] + params["b1"], 0.0)
    x = jnp.maximum(x @ params["w2"] + params["b2"], 0.0)
    x = jnp.maximum(x @ params["w3"] + params["b3"], 0.0)
    return x @ params["w4"] + params["b4"]


if __name__ == "__main__":
    key = jax.random.PRNGKey(0)
    k_params, k_state = jax.random.split(key)

    state_size = 16
    action_size = 4

    params = init_actor_params(k_params, state_size, action_size)
    packed = pack_actor_params(params)
    ep = _epilogue_dtype()

    # Two cases: tiny single-step grid, and a ragged two-step grid (200 % 104 != 0)
    # exercising the cdiv/OOB-padding path.
    for batch in (8, 200):
        state = jax.random.normal(jax.random.fold_in(k_state, batch),
                                  (batch, state_size), jnp.float32)
        logits = jax.block_until_ready(actor_forward(state, packed))

        ref_same = actor_forward_ref(state, params, ep)   # same bf16/epilogue math
        ref_f32 = actor_forward_ref_f32(state, params)    # full precision bound

        assert logits.shape == (batch, action_size)
        assert jnp.allclose(logits, ref_same, atol=2e-3, rtol=2e-3), \
            f"mismatch vs matched-precision reference (batch={batch})"
        assert jnp.allclose(logits, ref_f32, atol=5e-2, rtol=5e-2), \
            f"mismatch vs f32 reference beyond bf16 error bound (batch={batch})"

    print("KERNEL_OK")
</pallas_src>

<mosaic_0001>
module attributes {stable_mosaic.version = 11 : i64} {
  func.func @actor_kernel(%arg0: i32, %arg1: memref<8x16xf32, #tpu.memory_space<vmem>>, %arg2: memref<16x64xbf16, #tpu.memory_space<vmem>>, %arg3: memref<64x64xbf16, #tpu.memory_space<vmem>>, %arg4: memref<64x32xbf16, #tpu.memory_space<vmem>>, %arg5: memref<32x128xbf16, #tpu.memory_space<vmem>>, %arg6: memref<4x128xf32, #tpu.memory_space<vmem>>, %arg7: memref<8x4xf32, #tpu.memory_space<vmem>>) attributes {dimension_semantics = [#tpu.dimension_semantics<parallel>], iteration_bounds = array<i64: 1>, scalar_prefetch = 0 : i64, scratch_operands = 0 : i64, tpu.core_type = #tpu.core_type<tc>, window_params = [{transform_indices = @transform_0, window_bounds = array<i64: 8, 16>}, {pipeline_mode = #tpu.pipeline_mode<synchronous>, transform_indices = @transform_1, window_bounds = array<i64: 16, 64>}, {pipeline_mode = #tpu.pipeline_mode<synchronous>, transform_indices = @transform_2, window_bounds = array<i64: 64, 64>}, {pipeline_mode = #tpu.pipeline_mode<synchronous>, transform_indices = @transform_3, window_bounds = array<i64: 64, 32>}, {pipeline_mode = #tpu.pipeline_mode<synchronous>, transform_indices = @transform_4, window_bounds = array<i64: 32, 128>}, {pipeline_mode = #tpu.pipeline_mode<synchronous>, transform_indices = @transform_5, window_bounds = array<i64: 4, 128>}, {transform_indices = @transform_6, window_bounds = array<i64: 8, 4>}]} {
    %c0 = arith.constant 0 : index
    %c0_0 = arith.constant 0 : index
    %0 = vector.load %arg6[%c0, %c0_0] : memref<4x128xf32, #tpu.memory_space<vmem>>, vector<4x128xf32>
    %c0_1 = arith.constant 0 : index
    %c0_2 = arith.constant 0 : index
    %1 = vector.load %arg1[%c0_1, %c0_2] : memref<8x16xf32, #tpu.memory_space<vmem>>, vector<8x16xf32>
    %2 = arith.truncf %1 : vector<8x16xf32> to vector<8x16xbf16>
    %c0_3 = arith.constant 0 : index
    %c0_4 = arith.constant 0 : index
    %3 = vector.load %arg2[%c0_3, %c0_4] : memref<16x64xbf16, #tpu.memory_space<vmem>>, vector<16x64xbf16>
    %cst = arith.constant dense<0.000000e+00> : vector<8x64xf32>
    %4 = tpu.matmul %2, %3, %cst {dimension_numbers = #tpu.dot_dimension_numbers<[1], [0], [0], [1], [0, 0, 1, 1], [], []>} : vector<8x16xbf16>, vector<16x64xbf16>, vector<8x64xf32> -> vector<8x64xf32>
    %5 = vector.extract_strided_slice %0 {offsets = [0, 0], sizes = [1, 64], strides = [1, 1]} : vector<4x128xf32> to vector<1x64xf32>
    %6 = vector.shape_cast %5 : vector<1x64xf32> to vector<64xf32>
    %7 = vector.shape_cast %6 : vector<64xf32> to vector<1x64xf32>
    %8 = vector.broadcast %7 : vector<1x64xf32> to vector<8x64xf32>
    %9 = arith.addf %4, %8 : vector<8x64xf32>
    %cst_5 = arith.constant 0.000000e+00 : f32
    %10 = vector.broadcast %cst_5 : f32 to vector<8x64xf32>
    %11 = arith.maximumf %9, %10 : vector<8x64xf32>
    %12 = arith.truncf %11 : vector<8x64xf32> to vector<8x64xbf16>
    %c0_6 = arith.constant 0 : index
    %c0_7 = arith.constant 0 : index
    %13 = vector.load %arg3[%c0_6, %c0_7] : memref<64x64xbf16, #tpu.memory_space<vmem>>, vector<64x64xbf16>
    %cst_8 = arith.constant dense<0.000000e+00> : vector<8x64xf32>
    %14 = tpu.matmul %12, %13, %cst_8 {dimension_numbers = #tpu.dot_dimension_numbers<[1], [0], [0], [1], [0, 0, 1, 1], [], []>} : vector<8x64xbf16>, vector<64x64xbf16>, vector<8x64xf32> -> vector<8x64xf32>
    %15 = vector.extract_strided_slice %0 {offsets = [1, 0], sizes = [1, 64], strides = [1, 1]} : vector<4x128xf32> to vector<1x64xf32>
    %16 = vector.shape_cast %15 : vector<1x64xf32> to vector<64xf32>
    %17 = vector.shape_cast %16 : vector<64xf32> to vector<1x64xf32>
    %18 = vector.broadcast %17 : vector<1x64xf32> to vector<8x64xf32>
    %19 = arith.addf %14, %18 : vector<8x64xf32>
    %cst_9 = arith.constant 0.000000e+00 : f32
    %20 = vector.broadcast %cst_9 : f32 to vector<8x64xf32>
    %21 = arith.maximumf %19, %20 : vector<8x64xf32>
    %22 = arith.truncf %21 : vector<8x64xf32> to vector<8x64xbf16>
    %c0_10 = arith.constant 0 : index
    %c0_11 = arith.constant 0 : index
    %23 = vector.load %arg4[%c0_10, %c0_11] : memref<64x32xbf16, #tpu.memory_space<vmem>>, vector<64x32xbf16>
    %cst_12 = arith.constant dense<0.000000e+00> : vector<8x32xf32>
    %24 = tpu.matmul %22, %23, %cst_12 {dimension_numbers = #tpu.dot_dimension_numbers<[1], [0], [0], [1], [0, 0, 1, 1], [], []>} : vector<8x64xbf16>, vector<64x32xbf16>, vector<8x32xf32> -> vector<8x32xf32>
    %25 = vector.extract_strided_slice %0 {offsets = [2, 0], sizes = [1, 32], strides = [1, 1]} : vector<4x128xf32> to vector<1x32xf32>
    %26 = vector.shape_cast %25 : vector<1x32xf32> to vector<32xf32>
    %27 = vector.shape_cast %26 : vector<32xf32> to vector<1x32xf32>
    %28 = vector.broadcast %27 : vector<1x32xf32> to vector<8x32xf32>
    %29 = arith.addf %24, %28 : vector<8x32xf32>
    %cst_13 = arith.constant 0.000000e+00 : f32
    %30 = vector.broadcast %cst_13 : f32 to vector<8x32xf32>
    %31 = arith.maximumf %29, %30 : vector<8x32xf32>
    %32 = arith.truncf %31 : vector<8x32xf32> to vector<8x32xbf16>
    %c0_14 = arith.constant 0 : index
    %c0_15 = arith.constant 0 : index
    %33 = vector.load %arg5[%c0_14, %c0_15] : memref<32x128xbf16, #tpu.memory_space<vmem>>, vector<32x128xbf16>
    %cst_16 = arith.constant dense<0.000000e+00> : vector<8x128xf32>
    %34 = tpu.matmul %32, %33, %cst_16 {dimension_numbers = #tpu.dot_dimension_numbers<[1], [0], [0], [1], [0, 0, 1, 1], [], []>} : vector<8x32xbf16>, vector<32x128xbf16>, vector<8x128xf32> -> vector<8x128xf32>
    %35 = vector.extract_strided_slice %34 {offsets = [0, 0], sizes = [8, 4], strides = [1, 1]} : vector<8x128xf32> to vector<8x4xf32>
    %36 = vector.extract_strided_slice %0 {offsets = [3, 0], sizes = [1, 4], strides = [1, 1]} : vector<4x128xf32> to vector<1x4xf32>
    %37 = vector.shape_cast %36 : vector<1x4xf32> to vector<4xf32>
    %38 = vector.shape_cast %37 : vector<4xf32> to vector<1x4xf32>
    %39 = vector.broadcast %38 : vector<1x4xf32> to vector<8x4xf32>
    %40 = arith.addf %35, %39 : vector<8x4xf32>
    %c0_17 = arith.constant 0 : index
    %c0_18 = arith.constant 0 : index
    %41 = vector.load %arg7[%c0_17, %c0_18] : memref<8x4xf32, #tpu.memory_space<vmem>>, vector<8x4xf32>
    tpu.vector_store %arg7[%c0_17, %c0_18], %40 {strides = array<i32>} : memref<8x4xf32, #tpu.memory_space<vmem>>, vector<8x4xf32>,
    return
  }
  func.func @transform_0(%arg0: i32) -> (i32, i32) {
    %c0_i32 = arith.constant 0 : i32
    %c0_i32_0 = arith.constant 0 : i32
    return %arg0, %c0_i32 : i32, i32
  }
  func.func @transform_1(%arg0: i32) -> (i32, i32) {
    %c0_i32 = arith.constant 0 : i32
    %c0_i32_0 = arith.constant 0 : i32
    %c0_i32_1 = arith.constant 0 : i32
    return %c0_i32, %c0_i32_0 : i32, i32
  }
  func.func @transform_2(%arg0: i32) -> (i32, i32) {
    %c0_i32 = arith.constant 0 : i32
    %c0_i32_0 = arith.constant 0 : i32
    %c0_i32_1 = arith.constant 0 : i32
    return %c0_i32, %c0_i32_0 : i32, i32
  }
  func.func @transform_3(%arg0: i32) -> (i32, i32) {
    %c0_i32 = arith.constant 0 : i32
    %c0_i32_0 = arith.constant 0 : i32
    %c0_i32_1 = arith.constant 0 : i32
    return %c0_i32, %c0_i32_0 : i32, i32
  }
  func.func @transform_4(%arg0: i32) -> (i32, i32) {
    %c0_i32 = arith.constant 0 : i32
    %c0_i32_0 = arith.constant 0 : i32
    %c0_i32_1 = arith.constant 0 : i32
    return %c0_i32, %c0_i32_0 : i32, i32
  }
  func.func @transform_5(%arg0: i32) -> (i32, i32) {
    %c0_i32 = arith.constant 0 : i32
    %c0_i32_0 = arith.constant 0 : i32
    %c0_i32_1 = arith.constant 0 : i32
    return %c0_i32, %c0_i32_0 : i32, i32
  }
  func.func @transform_6(%arg0: i32) -> (i32, i32) {
    %c0_i32 = arith.constant 0 : i32
    %c0_i32_0 = arith.constant 0 : i32
    return %arg0, %c0_i32 : i32, i32
  }
}

</mosaic_0001>

<bundles_post_ra>
// kernel: tpu_custom_call.1
= control target key start
LH: loop header
LB: loop body
LE: loop exit
PB: predicated region body
PF: predicated region fallthrough
CT: control target
= control target key end

     0   :  { %11 = vsyncpa [#allocation3], 0  ;;  %s594_s0 = inlined_call_operand.hbm [shape: f32[8,16], index: 0, kind: input, shape index: {}]   ;;  %s595_s1 = inlined_call_operand.hbm [shape: bf16[16,64], index: 1, kind: input, shape index: {}]   ;;  %s596_s2 = inlined_call_operand.vmem [shape: bf16[64,64], index: 2, kind: input, shape index: {}]   ;;  %s597_s3 = inlined_call_operand.vmem [shape: bf16[64,32], index: 3, kind: input, shape index: {}]   ;;  %s598_s4 = inlined_call_operand.vmem [shape: bf16[32,128], index: 4, kind: input, shape index: {}]   ;;  %s599_s5 = inlined_call_operand.vmem [shape: f32[4,128], index: 5, kind: input, shape index: {}]   ;;  %s600_s6 = inlined_call_operand.vmem [shape: f32[8,4], index: 6, kind: output, shape index: {}]  }
   0x1   :  { %12 = vsyncpa [#allocation5], 0  ;;  %s480_s21 = smov [#allocation2]   ;;  %s481_s23 = smov [#allocation4]  }
   0x2   :  { %s19_s22 = sshll.u32 %s480_s21, 4  ;;  %s28_s24 = sshll.u32 %s481_s23, 4  ;;  %s20_s22 = int_to_ptr.vmem [resolvable:$true] %s19_s22  ;;  %s521_s24 = int_to_ptr.vmem [resolvable:$true] %s28_s24 }
   0x3   :  { %s432_s27 = scalar_lea.hbm %s594_s0, 128 }
   0x4   :  { %p433_p0 = scmp.ne.s32.totalorder %s594_s0, %s432_s27  ;;  %p436_p1 = scmp.lt.u32.totalorder %s432_s27, %s594_s0 }
   0x6   :  { %p438_p2 = pnand %p436_p1, %p433_p0 }
   0x8   :  { %441 = shalt.err (!%p438_p2)
}
   0x9   :  { %s442_s8 = scalar_lea.vmem %s20_s22, 128  ;;  %p447_p4 = scmp.lt.s32.totalorder %s20_s22, %s20_s22 }
   0xa   :  { %p443_p3 = scmp.ne.s32.totalorder %s20_s22, %s442_s8  ;;  %p448_p5 = scmp.lt.s32.totalorder %s442_s8, %s442_s8 }
   0xc   :  { %p449_p6 = por %p448_p5, %p447_p4 }
   0xe   :  { %p450_p7 = pnand %p449_p6, %p443_p3 }
  0x10   :  { %453 = shalt.err (!%p450_p7)
}
  0x11   :  { %22 = dma.hbm_to_vmem [thread:$0]  %s594_s0, 128, %s20_s22, [#allocation3]  }
  0x12   :  { %s454_s13 = scalar_lea.hbm %s595_s1, 128 }
  0x13   :  { %p455_p8 = scmp.ne.s32.totalorder %s595_s1, %s454_s13  ;;  %p458_p9 = scmp.lt.u32.totalorder %s454_s13, %s595_s1 }
  0x15   :  { %p460_p10 = pnand %p458_p9, %p455_p8 }
  0x17   :  { %463 = shalt.err (!%p460_p10)
}
  0x18   :  { %s464_s18 = scalar_lea.vmem %s521_s24, 128  ;;  %p469_p12 = scmp.lt.s32.totalorder %s521_s24, %s521_s24 }
  0x19   :  { %p465_p11 = scmp.ne.s32.totalorder %s521_s24, %s464_s18  ;;  %p470_p13 = scmp.lt.s32.totalorder %s464_s18, %s464_s18 }
  0x1b   :  { %p471_p0 = por %p470_p13, %p469_p12 }
  0x1d   :  { %p472_p1 = pnand %p471_p0, %p465_p11 }
  0x1f   :  { %475 = shalt.err (!%p472_p1)
}
  0x20   :  { %s482_s0 = smov 64   ;;  %s483_s19 = smov 4  }
  0x21   :  { %34 = dma.hbm_to_vmem [thread:$0]  %s595_s1, 128, %s521_s24, [#allocation5], %s482_s0, %s482_s0, %s483_s19  }
  0x22   :  { %476 = dma.done.wait [#allocation3], 128  }
  0x23   :  { %477 = vsyncadd [#allocation3], 4294967168 }
  0x24   :  { %478 = dma.done.wait [#allocation5], 128  }
  0x25   :  { %479 = vsyncadd [#allocation5], 4294967168  ;;  %v484_v0 = vmov 0.0   ;;  %vm485_vm0 = vmmov 0   ;;  %v421_v1 = vld [vmem:[#allocation4] sm:$0xff]   ;;  %v51_v2 = vld [vmem:[#allocation2] sm:$0xff]  ;;  %v55_v10 = vlaneseq }
  0x26   :  { %377 = vmatprep.subr.bf16.mxu0 %v484_v0  ;;  %379 = vmatprep.mubr.msk.bf16.mxu0 %vm485_vm0, %v484_v0  ;;  %v52_v3 = vpack.c.bf16 %v51_v2, %v51_v2  ;;  %vm65_vm1 = vcmask 130048   ;;  %v422_v4 = vld [vmem:[%s596_s2] sm:$0xff]   ;;  %v423_v5 = vld [vmem:[%s596_s2 + $0x8] sm:$0xff]   ;;  %v424_v6 = vld [vmem:[%s596_s2 + $0x10] sm:$0xff]   ;;  %vm147_vm2 = vcmask 523264   ;;  %vm290_vm3 = vcmask 261120  }
  0x27   :  { %383 = vmatprep.subr.bf16.mxu1 %v484_v0  ;;  %391 = vmatprep.mubr.msk.bf16.mxu1 %vm485_vm0, %v484_v0  ;;  %v425_v7 = vld [vmem:[%s596_s2 + $0x18] sm:$0xff]   ;;  %v426_v8 = vld [vmem:[%s597_s3] sm:$0xff]   ;;  %v427_v9 = vld [vmem:[%s597_s3 + $0x8] sm:$0xff]   ;;  %v56_v11 = vshrl.u32 %v55_v10, 7  ;;  %vm339_vm4 = vcmask 31744  }
  0x28   :  { %378 = vmatpush3.bf16.msra.mxu0 %v421_v1  ;;  %384 = vmatpush3.bf16.msra.mxu1 %v422_v4  ;;  %v50_v13 = vld [vmem:[%s599_s5] sm:$0xf]  ;;  %v428_v22 = vld [vmem:[%s597_s3 + $0x10] sm:$0xff]   ;;  %v429_v23 = vld [vmem:[%s597_s3 + $0x18] sm:$0xff]  }
  0x29   :  { %395 = vmatprep.subr.bf16.mxu0 %v484_v0  ;;  %385 = vmatprep.subr.bf16.mxu1 %v484_v0  ;;  %v57_v12 = vsub.s32 0, %v56_v11  ;;  %v430_v24 = vld [vmem:[%s598_s4] sm:$0xff]   ;;  %v121_v25 = vsub.s32 1, %v56_v11  ;;  %v431_v34 = vld [vmem:[%s598_s4 + $0x8] sm:$0xff]   ;;  %v203_v35 = vsub.s32 2, %v56_v11  ;;  %v336_v44 = vsub.s32 3, %v56_v11 }
  0x2b   :  { %380 = vmatmul.mubr.msk.bf16.vlgmr.msra.gmra.mrb[0].mxu0 %vm65_vm1, %v52_v3  ;;  %v58_v14 = vrot.slane %v50_v13, %v57_v12  ;;  %v122_v26 = vrot.slane %v50_v13, %v121_v25  ;;  %v204_v36 = vrot.slane %v50_v13, %v203_v35  ;;  %v337_v45 = vrot.slane %v50_v13, %v336_v44 }
  0x2c   :  { %403 = vmatprep.mubr.msk.bf16.mxu0 %vm485_vm0, %v484_v0  ;;  %386 = vmatpush3.bf16.msra.mxu1 %v423_v5 }
  0x2d   :  { %387 = vmatprep.subr.bf16.mxu1 %v484_v0  ;;  %396 = vmatpush3.bf16.msra.mxu0 %v426_v8 }
  0x2e   :  { %397 = vmatprep.subr.bf16.mxu0 %v484_v0 }
  0x30   :  { %388 = vmatpush3.bf16.msra.mxu1 %v424_v6 }
  0x31   :  { %389 = vmatprep.subr.bf16.mxu1 %v484_v0  ;;  %398 = vmatpush3.bf16.msra.mxu0 %v427_v9 }
  0x32   :  { %399 = vmatprep.subr.bf16.mxu0 %v484_v0 }
  0x34   :  { %390 = vmatpush3.bf16.msra.mxu1 %v425_v7 }
  0x35   :  { %407 = vmatprep.subr.bf16.mxu1 %v484_v0  ;;  %400 = vmatpush3.bf16.msra.mxu0 %v428_v22 }
  0x36   :  { %401 = vmatprep.subr.bf16.mxu0 %v484_v0 }
  0x39   :  { %402 = vmatpush3.bf16.msra.mxu0 %v429_v23 }
  0xfe   :  { %v103_v15 = vpop.f32.mrb[0].mxu0 }
  0xff   :  { %v104_v16 = vadd.f32 %v103_v15, %v58_v14  ;;  %v381_v17 = vpop.f32.mrb[1].mxu0 }
 0x100   :  { %v106_v18 = vpop.f32.mrb[2].mxu0 }
 0x101   :  { %v109_v19 = vmax.f32 %v104_v16, 0.0  ;;  %v382_v20 = vpop.f32.mrb[3].mxu0 }
 0x103   :  { %v110_v21 = vpack.c.bf16 %v109_v19, %v109_v19 }
 0x105   :  { %392 = vmatmul.mubr.msk.bf16.vlgmr.msra.gmra.mrb[0].mxu1 %vm147_vm2, %v110_v21 }
 0x106   :  { %411 = vmatprep.mubr.msk.bf16.mxu1 %vm485_vm0, %v484_v0  ;;  %408 = vmatpush3.bf16.msra.mxu1 %v430_v24 }
 0x107   :  { %409 = vmatprep.subr.bf16.mxu1 %v484_v0 }
 0x10a   :  { %410 = vmatpush3.bf16.msra.mxu1 %v431_v34 }
 0x1d8   :  { %v185_v27 = vpop.f32.mrb[0].mxu1 }
 0x1d9   :  { %v186_v28 = vadd.f32 %v185_v27, %v122_v26  ;;  %v393_v29 = vpop.f32.mrb[1].mxu1 }
 0x1da   :  { %v188_v30 = vpop.f32.mrb[2].mxu1 }
 0x1db   :  { %v191_v31 = vmax.f32 %v186_v28, 0.0  ;;  %v394_v32 = vpop.f32.mrb[3].mxu1 }
 0x1dd   :  { %v192_v33 = vpack.c.bf16 %v191_v31, %v191_v31 }
 0x1df   :  { %404 = vmatmul.mubr.msk.bf16.vlgmr.msra.gmra.mrb[4].mxu0 %vm147_vm2, %v192_v33 }
 0x2b2   :  { %v266_v37 = vpop.f32.mrb[4].mxu0 }
 0x2b3   :  { %v267_v38 = vadd.f32 %v266_v37, %v204_v36  ;;  %v405_v39 = vpop.f32.mrb[5].mxu0 }
 0x2b4   :  { %v269_v40 = vpop.f32.mrb[6].mxu0 }
 0x2b5   :  { %v272_v41 = vmax.f32 %v267_v38, 0.0  ;;  %v406_v42 = vpop.f32.mrb[7].mxu0 }
 0x2b7   :  { %v273_v43 = vpack.c.bf16 %v272_v41, %v272_v41 }
 0x2b9   :  { %412 = vmatmul.mubr.msk.bf16.vlgmr.msra.gmra.mrb[4].mxu1 %vm290_vm3, %v273_v43 }
 0x38c   :  { %v328_v46 = vpop.f32.mrb[4].mxu1 }
 0x38d   :  { %v338_v47 = vadd.f32 %v337_v45, %v328_v46  ;;  %v413_v48 = vpop.f32.mrb[5].mxu1 }
 0x38e   :  { %v331_v49 = vpop.f32.mrb[6].mxu1 }
 0x38f   :  { %340 = vst.msk [vmem:[%s600_s6] sm:$0xff] %vm339_vm4, %v338_v47  ;;  %v414_v50 = vpop.f32.mrb[7].mxu1 }
 0x390   :  { %345 = vsyncpa [#allocation3], 1 }
 0x391   :  { %346 = vsyncpa [#allocation5], 1 }

</bundles_post_ra>
